<compile_context>
chip_gen: v6e
topology: v6e:2x2x1
jax: 0.10.0
libtpu: 0.0.40
codegen_flags: <defaults>
</compile_context>

<pallas_src>
import functools

import jax
import jax.numpy as jnp
from jax.experimental import pallas as pl
from jax.experimental.pallas import tpu as pltpu

_MIB = 1024 * 1024


def _round_up(x: int, m: int) -> int:
    return ((x + m - 1) // m) * m


def _vmem_budget_bytes() -> int:
    """Physical per-core VMEM minus headroom for compiler-internal scratch."""
    cap = 64 * _MIB  # conservative (v7x-sized) default if query fails
    try:
        info = pltpu.get_tpu_info()
        cap = int(getattr(info, "vmem_capacity_bytes", cap))
    except Exception:
        pass
    return max(cap - 12 * _MIB, 16 * _MIB)


# ---------------- resident-W path (the common LinearOperator case) ----------


def _linear_resident_kernel(x_ref, wt_ref, o_ref):
    # x_ref: (tm, dim) streamed rows, wt_ref: (dim, dim) == W.T (resident),
    # o_ref: (tm, dim).   out = x @ W.T  — plain NN-form MXU matmul.
    o_ref[...] = jnp.dot(
        x_ref[...], wt_ref[...], preferred_element_type=jnp.float32
    ).astype(o_ref.dtype)


# ---------------- K/N-tiled fallback (very large dim only) ------------------


def _linear_tiled_kernel(x_ref, wt_ref, o_ref, acc_ref):
    # x_ref: (tm, tk), wt_ref: (tk, tn) block of W.T, o_ref: (tm, tn),
    # acc_ref: (tm, tn) f32 accumulator persisting across the K grid axis.
    @pl.when(pl.program_id(2) == 0)
    def _():
        acc_ref[...] = jnp.zeros_like(acc_ref)

    acc_ref[...] += jnp.dot(
        x_ref[...], wt_ref[...], preferred_element_type=jnp.float32
    )

    @pl.when(pl.program_id(2) == pl.num_programs(2) - 1)
    def _():
        o_ref[...] = acc_ref[...].astype(o_ref.dtype)


def linear_operator_forward(embeddings: jax.Array, weight: jax.Array,
                            *, tile_rows: int = 512) -> jax.Array:
    """Pallas implementation of LinearOperator.forward.

    embeddings: (..., dim) float array.
    weight:     (dim, dim) linear_transformation parameter.
    Returns an array of the same shape as `embeddings` with
    out[..., i] = sum_j weight[i, j] * embeddings[..., j].
    """
    dim = weight.shape[0]
    assert weight.shape == (dim, dim)
    assert embeddings.shape[-1] == dim, "last dim must equal operator dim"

    lead_shape = embeddings.shape[:-1]
    n = 1
    for d in lead_shape:
        n *= d
    out_dtype = embeddings.dtype

    if n == 0:  # empty leading dims: nothing to compute
        return jnp.zeros(embeddings.shape, out_dtype)

    x = embeddings.reshape(n, dim)
    # One cheap (dim x dim) transpose in the wrapper -> the kernel runs a
    # standard NN-form matmul (no per-block transpose of the W tile on the
    # vector-extended slot).
    wt = weight.T

    x_bytes = jnp.dtype(x.dtype).itemsize
    w_bytes = jnp.dtype(wt.dtype).itemsize
    o_bytes = jnp.dtype(out_dtype).itemsize

    budget = _vmem_budget_bytes()

    # Row tile: large (amortize per-step overhead), never larger than the
    # 8-rounded row count; split when there would be a single grid step so
    # both TensorCores get work on 2-TC chips.
    tm = max(8, min(tile_rows, _round_up(n, 8)))
    if pl.cdiv(n, tm) == 1 and n > 8:
        tm = max(8, _round_up(pl.cdiv(n, 2), 8))

    cost = pl.CostEstimate(
        flops=2 * n * dim * dim,
        transcendentals=0,
        bytes_accessed=(n * dim * x_bytes
                        + dim * dim * w_bytes
                        + n * dim * o_bytes),
    )

    # VMEM need for the resident-W path: W.T (budget 2 copies to be safe) +
    # double-buffered x / out row tiles.
    resident_need = (2 * dim * dim * w_bytes
                     + 2 * tm * dim * x_bytes
                     + 2 * tm * dim * o_bytes)

    if resident_need <= budget:
        # ---- W.T fully resident, 1-D grid streaming x: single HBM pass ----
        # No padding / slicing: full-feature-axis blocks are exempt from the
        # (8, 128) divisibility rule; Pallas masks the ragged final row block.
        grid = (pl.cdiv(n, tm),)
        vmem_limit = int(min(budget, max(2 * resident_need, 32 * _MIB)))
        out = pl.pallas_call(
            _linear_resident_kernel,
            out_shape=jax.ShapeDtypeStruct((n, dim), out_dtype),
            grid_spec=pltpu.PrefetchScalarGridSpec(
                num_scalar_prefetch=0,
                grid=grid,
                in_specs=[
                    pl.BlockSpec((tm, dim), lambda i: (i, 0)),    # x (streamed)
                    pl.BlockSpec((dim, dim), lambda i: (0, 0)),   # W.T (resident)
                ],
                out_specs=pl.BlockSpec((tm, dim), lambda i: (i, 0)),
            ),
            compiler_params=pltpu.CompilerParams(
                dimension_semantics=("parallel",),
                vmem_limit_bytes=vmem_limit,
            ),
            cost_estimate=cost,
        )(x, wt)
        return out.reshape(*lead_shape, dim)

    # ---- Fallback: dim too large for resident W -> K/N tiling ----
    # Cold path (dim in the thousands); pad feature axis to a 512 multiple so
    # the contraction tiles are exact (ragged K blocks would read unspecified
    # data into the accumulation).
    tk = tn = 512
    tm_f = min(tm, 256)
    dim_pad = _round_up(dim, tk)
    if dim_pad != dim:
        x = jnp.pad(x, ((0, 0), (0, dim_pad - dim)))
        wt = jnp.pad(wt, ((0, dim_pad - dim), (0, dim_pad - dim)))

    grid = (pl.cdiv(n, tm_f), dim_pad // tn, dim_pad // tk)
    vmem_need = (2 * tm_f * tk * x_bytes
                 + 2 * tk * tn * w_bytes
                 + 2 * tm_f * tn * o_bytes
                 + tm_f * tn * 4)
    vmem_limit = int(min(budget, max(2 * vmem_need, 32 * _MIB)))

    out = pl.pallas_call(
        _linear_tiled_kernel,
        out_shape=jax.ShapeDtypeStruct((n, dim_pad), out_dtype),
        grid_spec=pltpu.PrefetchScalarGridSpec(
            num_scalar_prefetch=0,
            grid=grid,
            in_specs=[
                pl.BlockSpec((tm_f, tk), lambda i, j, k: (i, k)),  # x rows
                pl.BlockSpec((tk, tn), lambda i, j, k: (k, j)),    # W.T block
            ],
            out_specs=pl.BlockSpec((tm_f, tn), lambda i, j, k: (i, j)),
            scratch_shapes=[pltpu.VMEM((tm_f, tn), jnp.float32)],
        ),
        compiler_params=pltpu.CompilerParams(
            dimension_semantics=("parallel", "parallel", "arbitrary"),
            vmem_limit_bytes=vmem_limit,
        ),
        cost_estimate=cost,
    )(x, wt)

    if dim_pad != dim:
        out = out[:, :dim]
    return out.reshape(*lead_shape, dim)


if __name__ == "__main__":
    dim = 32
    batch, seq = 2, 8

    key = jax.random.PRNGKey(0)
    embeddings = jax.random.normal(key, (batch, seq, dim), dtype=jnp.float32)

    # Parameter init per LinearOperator.__init__: identity matrix of size dim.
    weight = jnp.eye(dim, dtype=jnp.float32)

    fwd = jax.jit(functools.partial(linear_operator_forward))
    out = fwd(embeddings, weight)
    out = jax.block_until_ready(out)

    # Reference: out = emb @ W.T  (== torch.matmul(W, emb.unsqueeze(-1)).squeeze(-1))
    ref = jnp.einsum("ij,bsj->bsi", weight, embeddings)
    assert out.shape == embeddings.shape
    assert jnp.allclose(out, ref, atol=1e-5, rtol=1e-5)

    # Non-identity W, row count that is not a multiple of the row tile.
    k1, k2 = jax.random.split(key)
    emb2 = jax.random.normal(k1, (3, 37, dim), dtype=jnp.float32)
    w2 = jax.random.normal(k2, (dim, dim), dtype=jnp.float32)
    out2 = jax.block_until_ready(linear_operator_forward(emb2, w2))
    ref2 = jnp.einsum("ij,bsj->bsi", w2, emb2)
    assert jnp.allclose(out2, ref2, atol=1e-4, rtol=1e-4)

    # Tiny row count (< 8): relies on Pallas masking the ragged row block.
    emb3 = jax.random.normal(k1, (1, 3, dim), dtype=jnp.float32)
    out3 = jax.block_until_ready(linear_operator_forward(emb3, w2))
    ref3 = jnp.einsum("ij,bsj->bsi", w2, emb3)
    assert jnp.allclose(out3, ref3, atol=1e-4, rtol=1e-4)

    print("KERNEL_OK")
</pallas_src>

<mosaic_0001>
module attributes {stable_mosaic.version = 11 : i64} {
  func.func @_linear_resident_kernel(%arg0: i32, %arg1: memref<8x32xf32, #tpu.memory_space<vmem>>, %arg2: memref<32x32xf32, #tpu.memory_space<vmem>>, %arg3: memref<8x32xf32, #tpu.memory_space<vmem>>) attributes {dimension_semantics = [#tpu.dimension_semantics<parallel>], iteration_bounds = array<i64: 2>, scalar_prefetch = 0 : i64, scratch_operands = 0 : i64, tpu.core_type = #tpu.core_type<tc>, window_params = [{transform_indices = @transform_0, window_bounds = array<i64: 8, 32>}, {pipeline_mode = #tpu.pipeline_mode<synchronous>, transform_indices = @transform_1, window_bounds = array<i64: 32, 32>}, {transform_indices = @transform_2, window_bounds = array<i64: 8, 32>}]} {
    %c0 = arith.constant 0 : index
    %c0_0 = arith.constant 0 : index
    %0 = vector.load %arg1[%c0, %c0_0] : memref<8x32xf32, #tpu.memory_space<vmem>>, vector<8x32xf32>
    %c0_1 = arith.constant 0 : index
    %c0_2 = arith.constant 0 : index
    %1 = vector.load %arg2[%c0_1, %c0_2] : memref<32x32xf32, #tpu.memory_space<vmem>>, vector<32x32xf32>
    %cst = arith.constant dense<0.000000e+00> : vector<8x32xf32>
    %2 = tpu.matmul %0, %1, %cst {dimension_numbers = #tpu.dot_dimension_numbers<[1], [0], [0], [1], [0, 0, 1, 1], [], []>} : vector<8x32xf32>, vector<32x32xf32>, vector<8x32xf32> -> vector<8x32xf32>
    %c0_3 = arith.constant 0 : index
    %c0_4 = arith.constant 0 : index
    %3 = vector.load %arg3[%c0_3, %c0_4] : memref<8x32xf32, #tpu.memory_space<vmem>>, vector<8x32xf32>
    tpu.vector_store %arg3[%c0_3, %c0_4], %2 {strides = array<i32>} : memref<8x32xf32, #tpu.memory_space<vmem>>, vector<8x32xf32>,
    return
  }
  func.func @transform_0(%arg0: i32) -> (i32, i32) {
    %c0_i32 = arith.constant 0 : i32
    %c0_i32_0 = arith.constant 0 : i32
    return %arg0, %c0_i32 : i32, i32
  }
  func.func @transform_1(%arg0: i32) -> (i32, i32) {
    %c0_i32 = arith.constant 0 : i32
    %c0_i32_0 = arith.constant 0 : i32
    %c0_i32_1 = arith.constant 0 : i32
    return %c0_i32, %c0_i32_0 : i32, i32
  }
  func.func @transform_2(%arg0: i32) -> (i32, i32) {
    %c0_i32 = arith.constant 0 : i32
    %c0_i32_0 = arith.constant 0 : i32
    return %arg0, %c0_i32 : i32, i32
  }
}

</mosaic_0001>

<bundles_post_ra>
// kernel: linear_operator_forward.1
= control target key start
LH: loop header
LB: loop body
LE: loop exit
PB: predicated region body
PF: predicated region fallthrough
CT: control target
= control target key end

     0   :  { %7 = vsyncpa [#allocation3], 0  ;;  %s551_s0 = inlined_call_operand.vmem [shape: f32[16,32], index: 0, kind: input, shape index: {}]   ;;  %s552_s1 = inlined_call_operand.vmem [shape: f32[32,32], index: 1, kind: input, shape index: {}]   ;;  %s553_s2 = inlined_call_operand.hbm [shape: f32[16,32], index: 2, kind: output, shape index: {}]  }
   0x1   :  { %9 = vsyncpa [#allocation3 + $0x1], 0  ;;  %s440_s9 = smov 0   ;;  %s442_s10 = smov 0  }
   0x2   :  { %s444_s11 = smov 0   ;;  %s446_s12 = smov 0  }
   0x3 LB: > { %s461_s13 = sadd.s32 4294967295, %s420_s12   ;;  %s292_s14 = sadd.s32 4294967294, %s420_s12   ;;  %s420_s12 = sphi %s446_s12, %s559_s12   ;;  %s416_s11 = sphi %s444_s11, %s558_s11   ;;  %s412_s10 = sphi %s442_s10, %s557_s10   ;;  %s408_s9 = sphi %s440_s9, %s556_s9  }
   0x4   : > { %s465_s15 = sadd.s32 1, %s420_s12   ;;  %s69_s16 = sadd.s32 1, %s416_s11 }
   0x5   : > { %s66_s17 = ssub.s32 %s420_s12, %s465_s15  ;;  %p79_p0 = scmp.ne.s32.totalorder %s416_s11, %s412_s10 }
   0x6   : > { %p67_p1 = scmp.eq.s32.totalorder %s66_s17, 0  ;;  %p80_p2 = scmp.eq.s32.totalorder %s461_s13, 1 }
   0x7   : > { %p85_p3 = scmp.ne.s32.totalorder %s412_s10, %s408_s9  ;;  %p86_p4 = scmp.eq.s32.totalorder %s292_s14, 1 }
   0x8   : > { %s476_s18 = scalar_select %p67_p1, %s416_s11, %s69_s16  }
   0x9   : > { %p478_p5 = por %p80_p2, %p79_p0  ;;  %p482_p6 = por %p86_p4, %p85_p3 }
   0xa   : > { %p295_p7 = scmp.ge.s32.totalorder %s420_s12, 1  ;;  %p114_p8 = scmp.lt.s32.totalorder %s420_s12, 3 }
   0xc   : > { %p115_p9 = pnand %p295_p7, %p114_p8 }
   0xd   : > { %p135_p10 = scmp.lt.s32.totalorder (!%p115_p9), %s461_s13, 1  ;;  %s132_s6 = sand.u32 (!%p115_p9), 1, %s412_s10  }
   0xe   : > { %118 = sbr.rel (%p115_p9) target bundleno = 235 (0xeb), region = 28  ;;  %s296_s7 = sshll.u32 (!%p115_p9), %s132_s6, 3 }
   0xf   : > { %s300_s8 = sshll.u32 (!%p115_p9), %s461_s13, 7  ;;  %s134_s14 = scalar_lea.vmem (!%p115_p9), [#allocation2], %s296_s7 }
  0x10   : > { %s233_s16 = sshll.u32 (!%p115_p9), %s134_s14, 4  ;;  %s510_s22 = scalar_lea.hbm (!%p115_p9), %s553_s2, %s300_s8  ;;  %s512_s16 = int_to_ptr.vmem [resolvable:$true] %s233_s16 }
  0x11   : > { %s220_s23 = scalar_lea.sflag (!%p115_p9), [#allocation3], %s132_s6  ;;  %s360_s24 = scalar_lea.vmem (!%p115_p9), %s512_s16, 128 }
  0x12   : > { %p361_p11 = scmp.ne.s32.totalorder (!%p115_p9), %s512_s16, %s360_s24 }
  0x13   : > { %v143_v0 = vld [vmem:[%s552_s1 + $0x18] sm:$0xff]  ;;  %v422_v1 = vmov 0.0   ;;  %v142_v2 = vld [vmem:[%s552_s1 + $0x10] sm:$0xff]  ;;  %vm423_vm0 = vmmov 0   ;;  %s136_s25 = scalar_select %p135_p10, %s461_s13, 1  ;;  %v141_v3 = vld [vmem:[%s552_s1 + $0x8] sm:$0xff] }
  0x14   : > { %308 = vmatprep.subr.mxu0 %v422_v1  ;;  %316 = vmatprep.mubr.msk.f32.mxu0 %vm423_vm0, %v422_v1  ;;  %v140_v4 = vld [vmem:[%s552_s1] sm:$0xff]  ;;  %vm144_vm1 = vcmask 261120   ;;  %p362_p12 = pnand %p361_p11, %p478_p5  ;;  %s424_s13 = smov [#allocation2]  }
  0x15   : > { %309 = vmatpush3.msra.mxu0 %v143_v0  ;;  %s297_s28 = sshll.u32 %s136_s25, 3  ;;  %s364_s25 = sshll.u32 %s424_s13, 4  ;;  %s365_s25 = int_to_ptr.vmem [resolvable:$false] %s364_s25 }
  0x16   : > { %310 = vmatprep.subr.mxu0 %v422_v1  ;;  %s138_s5 = scalar_lea.vmem %s551_s0, %s297_s28  ;;  %p363_p13 = pneg %p362_p12 }
  0x17   : > { %311 = vmatpush3.msra.mxu0 %v142_v2  ;;  %v139_v5 = vld [vmem:[%s138_s5] sm:$0xff]  ;;  %s366_s26 = scalar_lea.vmem %s365_s25, 256  ;;  %p367_p0 = scmp.lt.s32.totalorder %s512_s16, %s365_s25 }
  0x18   : > { %312 = vmatprep.subr.mxu0 %v422_v1  ;;  %p368_p1 = scmp.lt.s32.totalorder %s366_s26, %s360_s24 }
  0x19   : > { %313 = vmatpush3.msra.mxu0 %v141_v3 }
  0x1a   : > { %314 = vmatprep.subr.mxu0 %v422_v1  ;;  %p369_p2 = por %p368_p1, %p367_p0 }
  0x1b   : > { %315 = vmatpush3.msra.mxu0 %v140_v4 }
  0x1c   : > { %317 = vmatmul.mubr.msk.f32.vlgmr.msra.gmra.mxu0 %vm144_vm1, %v139_v5  ;;  %p370_p3 = pnand %p369_p2, %p363_p13 }
  0xdc   : > { %v214_v6 = vpop.f32.mrf.mxu0 }
  0xdd   : > { %218 = vst.msk [vmem:[%s134_s14] sm:$0xff] %vm144_vm1, %v214_v6 }
  0xde   : > { %v318_v7 = vpop.f32.mrf.mxu0 }
  0xdf   : > { %373 = shalt.err (!%p370_p3)
}
  0xe0   : > { %s374_s27 = scalar_lea.hbm %s510_s22, 128  ;;  %s378_s30 = scalar_lea.hbm %s553_s2, 256 }
  0xe1   : > { %p375_p4 = scmp.ne.s32.totalorder %s510_s22, %s374_s27  ;;  %p379_p9 = scmp.lt.s32.totalorder %s510_s22, %s553_s2 }
  0xe2   : > { %p380_p10 = scmp.lt.s32.totalorder %s378_s30, %s374_s27 }
  0xe3   : > { %p376_p7 = pnand %p375_p4, %p478_p5 }
  0xe4   : > { %p381_p11 = por %p380_p10, %p379_p9 }
  0xe5   : > { %p377_p8 = pneg %p376_p7 }
  0xe7   : > { %p382_p12 = pnand %p381_p11, %p377_p8 }
  0xe9   : > { %385 = shalt.err (!%p382_p12)
}
  0xea   : > { %319 = dma.vmem_to_hbm [thread:$0]  (%p478_p5), %s512_s16, 128, %s510_s22, %s220_s23  }
  0xeb PF: > { %p325_p13 = scmp.ge.s32.totalorder %s420_s12, 2  ;;  %s245_s5 = sand.u32 1, %s408_s9  }
  0xec   : > { %s246_s6 = scalar_lea.sflag [#allocation3], %s245_s5 }
  0xed   : > { %p322_p0 = pnand %p325_p13, %p482_p6 }
  0xef   : > { %p323_p1 = pneg %p322_p0 }
  0xf1   : > { %403 = dma.done.wait (%p323_p1), %s246_s6, 128  }
  0xf2   : > { %405 = vsyncadd (%p323_p1), %s246_s6, 4294967168  ;;  %p12_p2 = scmp.ge.s32.totalorder %s465_s15, 4   ;;  %s556_s9 = smov %s412_s10 }
  0xf3   : > { %s557_s10 = smov %s416_s11  ;;  %s558_s11 = smov %s476_s18 }
  0xf4   : > { %s559_s12 = smov %s465_s15  ;;  %14 = sbr.rel (!%p12_p2) target bundleno = 3 (0x3), region = 63 }
  0xf9   :  { %251 = vsyncpa [#allocation3], 1 }
  0xfa   :  { %253 = vsyncpa [#allocation3 + $0x1], 1 }

</bundles_post_ra>
